<compile_context>
chip_gen: v7x
topology: tpu7x:2x2x1
jax: 0.10.0
libtpu: 0.0.40
codegen_flags: <defaults>
</compile_context>

<pallas_src>
import functools

import jax
import jax.numpy as jnp
from jax.experimental import pallas as pl
from jax.experimental.pallas import tpu as pltpu


_X_BUDGET_BYTES = 16 << 20   # per pipeline buffer of x (2 buffers -> 32 MiB)
_VMEM_LIMIT_BYTES = 48 << 20  # raises v5e's 16 MiB scoped default; < v7x 64 MiB/TC


def _round_up(x, m):
    return ((x + m - 1) // m) * m


def _cdiv(a, b):
    return (a + b - 1) // b


# --------------------------- kernels ---------------------------------------

def _mlp_head_kernel_flat(x_ref, w1_ref, b1_ref, w2_ref, b2_ref, o_ref, *, C, HW):
    """x_ref: (tile_b, C*HW) lane-dense slab; HW % 128 == 0 so each channel is
    a lane-aligned static slice.  Pooling mean scale + BN are folded into w1/b1."""
    # TODO(synk): for very large C the static unroll below bloats compile time;
    #             such heads should fall back to the 3-D block path.
    cols = []
    for c in range(C):                                           # static unroll
        slab = x_ref[:, c * HW:(c + 1) * HW].astype(jnp.float32)
        cols.append(jnp.sum(slab, axis=-1, keepdims=True))        # (tile_b, 1)
    pooled = jnp.concatenate(cols, axis=-1)                       # (tile_b, C) SUM

    # fc[0] Linear (+ folded 1/HW and fc[1] eval-mode BatchNorm1d)
    h = jnp.dot(pooled, w1_ref[...],
                preferred_element_type=jnp.float32) + b1_ref[...]
    # fc[2] ReLU
    h = jnp.maximum(h, 0.0)
    # fc[3] Dropout -- identity in eval mode.
    # fc[4] Linear(hidden -> out_dim)
    out = jnp.dot(h, w2_ref[...],
                  preferred_element_type=jnp.float32) + b2_ref[...]
    o_ref[...] = out.astype(o_ref.dtype)


def _mlp_head_kernel_3d(x_ref, w1_ref, b1_ref, w2_ref, b2_ref, o_ref):
    """Fallback when HW is not a multiple of 128: (tile_b, C, HW) block."""
    x = x_ref[...].astype(jnp.float32)
    pooled = jnp.sum(x, axis=-1)                                  # (tile_b, C) SUM
    h = jnp.dot(pooled, w1_ref[...],
                preferred_element_type=jnp.float32) + b1_ref[...]
    h = jnp.maximum(h, 0.0)
    out = jnp.dot(h, w2_ref[...],
                  preferred_element_type=jnp.float32) + b2_ref[...]
    o_ref[...] = out.astype(o_ref.dtype)


# --------------------------- wrapper ----------------------------------------

def _choose_tile_b(B, padded_row_bytes):
    """Batch tile: largest multiple of 8 whose double-buffered x block fits the
    per-buffer budget (layout padding already included in padded_row_bytes)."""
    tile = (_X_BUDGET_BYTES // max(1, padded_row_bytes)) // 8 * 8
    tile = max(8, tile)
    if tile >= B:
        return B                       # one full-batch block (dim == array dim)
    steps = _cdiv(B, tile)
    if steps % 2 == 1:                 # prefer an even step count for v7x's 2 TCs
        alt = _round_up(_cdiv(B, steps + 1), 8)
        if 0 < alt < B and _cdiv(B, alt) % 2 == 0:
            tile = alt
    return tile


def _const_spec(shape):
    return pl.BlockSpec(shape, lambda i: (0,) * len(shape))


def mlp_head(x_nchw, params, eps=1e-5):
    """x_nchw: (B, C, H, W).  Returns (B, out_dim) float32 (eval-mode forward)."""
    B, C, H, W = x_nchw.shape
    HW = H * W

    w1, b1, gamma, beta, rmean, rvar, w2, b2 = params
    hidden = w1.shape[1]
    out_dim = w2.shape[1]

    # --- Fold eval-mode BatchNorm1d AND the 1/HW pooling scale into Linear #1.
    inv_std = jax.lax.rsqrt(rvar.astype(jnp.float32) + eps)
    scale = gamma.astype(jnp.float32) * inv_std                    # (hidden,)
    w1f = w1.astype(jnp.float32) * scale[None, :] / float(HW)      # (C, hidden)
    b1f = (b1.astype(jnp.float32) - rmean.astype(jnp.float32)) * scale \
          + beta.astype(jnp.float32)                               # (hidden,)

    b1_2d = b1f.reshape(1, hidden)
    w2f = w2.astype(jnp.float32)
    b2_2d = b2.astype(jnp.float32).reshape(1, out_dim)

    itemsize = jnp.dtype(x_nchw.dtype).itemsize
    flat = (HW % 128 == 0)

    if flat:
        x = x_nchw.reshape(B, C * HW)                              # free reshape
        padded_row_bytes = _round_up(C * HW, 128) * itemsize
    else:
        x = x_nchw.reshape(B, C, HW)
        padded_row_bytes = _round_up(C, 8) * _round_up(HW, 128) * itemsize

    tile_b = _choose_tile_b(B, padded_row_bytes)
    grid = (_cdiv(B, tile_b),)

    if flat:
        kernel = functools.partial(_mlp_head_kernel_flat, C=C, HW=HW)
        x_spec = pl.BlockSpec((tile_b, C * HW), lambda i: (i, 0))
    else:
        kernel = _mlp_head_kernel_3d
        x_spec = pl.BlockSpec((tile_b, C, HW), lambda i: (i, 0, 0))

    # Advisory cost hint: kernel is dominated by the pooling HBM read.
    flops = B * C * HW + 2 * B * C * hidden + 2 * B * hidden * out_dim
    bytes_accessed = (itemsize * B * C * HW
                      + 4 * (C * hidden + hidden + hidden * out_dim + out_dim
                             + B * out_dim))

    out = pl.pallas_call(
        kernel,
        out_shape=jax.ShapeDtypeStruct((B, out_dim), jnp.float32),
        grid=grid,
        in_specs=[
            x_spec,                            # pipelined over the batch axis
            _const_spec((C, hidden)),          # folded W1 (in, out)
            _const_spec((1, hidden)),          # folded b1
            _const_spec((hidden, out_dim)),    # W2 (in, out)
            _const_spec((1, out_dim)),         # b2
        ],
        out_specs=pl.BlockSpec((tile_b, out_dim), lambda i: (i, 0)),
        compiler_params=pltpu.CompilerParams(
            dimension_semantics=("parallel",),
            vmem_limit_bytes=_VMEM_LIMIT_BYTES),
        cost_estimate=pl.CostEstimate(
            flops=flops, transcendentals=0, bytes_accessed=bytes_accessed),
    )(x, w1f, b1_2d, w2f, b2_2d)

    return out


# --------------------------- params / reference ------------------------------

def init_params(key, in_features, hidden_dim=32, out_dim=2):
    """Deterministic synthetic parameters (shapes match nn.Linear / BatchNorm1d)."""
    k1, k2, k3, k4 = jax.random.split(key, 4)
    bound1 = 1.0 / jnp.sqrt(in_features)
    w1 = jax.random.uniform(k1, (in_features, hidden_dim), jnp.float32, -bound1, bound1)
    b1 = jax.random.uniform(k2, (hidden_dim,), jnp.float32, -bound1, bound1)
    gamma = jnp.ones((hidden_dim,), jnp.float32)
    beta = jnp.zeros((hidden_dim,), jnp.float32)
    rmean = jnp.zeros((hidden_dim,), jnp.float32)
    rvar = jnp.ones((hidden_dim,), jnp.float32)
    bound2 = 1.0 / jnp.sqrt(hidden_dim)
    w2 = jax.random.uniform(k3, (hidden_dim, out_dim), jnp.float32, -bound2, bound2)
    b2 = jax.random.uniform(k4, (out_dim,), jnp.float32, -bound2, bound2)
    return (w1, b1, gamma, beta, rmean, rvar, w2, b2)


def _reference(x_nchw, params, eps=1e-5):
    """Pure-JAX reference (eval-mode forward) for sanity checking."""
    w1, b1, gamma, beta, rmean, rvar, w2, b2 = params
    pooled = jnp.mean(x_nchw, axis=(2, 3))
    h = pooled @ w1 + b1
    h = (h - rmean) / jnp.sqrt(rvar + eps) * gamma + beta
    h = jnp.maximum(h, 0.0)
    return h @ w2 + b2


if __name__ == "__main__":
    key = jax.random.PRNGKey(0)
    kx, kp = jax.random.split(key)

    B, C, H, W = 2, 4, 16, 16
    hidden_dim, out_dim = 32, 2

    x = jax.random.normal(kx, (B, C, H, W), jnp.float32)
    params = init_params(kp, in_features=C, hidden_dim=hidden_dim, out_dim=out_dim)

    out = mlp_head(x, params)
    out = jax.block_until_ready(out)

    ref = _reference(x, params)
    assert out.shape == (B, out_dim), out.shape
    assert jnp.allclose(out, ref, atol=1e-5, rtol=1e-5), (out, ref)

    print("KERNEL_OK")
</pallas_src>

<mosaic_0001>
module attributes {stable_mosaic.version = 11 : i64} {
  func.func @_mlp_head_kernel_flat(%arg0: i32, %arg1: memref<2x1024xf32, #tpu.memory_space<vmem>>, %arg2: memref<4x32xf32, #tpu.memory_space<vmem>>, %arg3: memref<1x32xf32, #tpu.memory_space<vmem>>, %arg4: memref<32x2xf32, #tpu.memory_space<vmem>>, %arg5: memref<1x2xf32, #tpu.memory_space<vmem>>, %arg6: memref<2x2xf32, #tpu.memory_space<vmem>>) attributes {dimension_semantics = [#tpu.dimension_semantics<parallel>], iteration_bounds = array<i64: 1>, scalar_prefetch = 0 : i64, scratch_operands = 0 : i64, tpu.core_type = #tpu.core_type<tc>, window_params = [{transform_indices = @transform_0, window_bounds = array<i64: 2, 1024>}, {pipeline_mode = #tpu.pipeline_mode<synchronous>, transform_indices = @transform_1, window_bounds = array<i64: 4, 32>}, {pipeline_mode = #tpu.pipeline_mode<synchronous>, transform_indices = @transform_2, window_bounds = array<i64: 1, 32>}, {pipeline_mode = #tpu.pipeline_mode<synchronous>, transform_indices = @transform_3, window_bounds = array<i64: 32, 2>}, {pipeline_mode = #tpu.pipeline_mode<synchronous>, transform_indices = @transform_4, window_bounds = array<i64: 1, 2>}, {transform_indices = @transform_5, window_bounds = array<i64: 2, 2>}]} {
    %c0 = arith.constant 0 : index
    %c0_0 = arith.constant 0 : index
    %0 = vector.load %arg1[%c0, %c0_0] : memref<2x1024xf32, #tpu.memory_space<vmem>>, vector<2x256xf32>
    %cst = arith.constant dense<0.000000e+00> : vector<2xf32>
    %1 = vector.multi_reduction <add>, %0, %cst [1] : vector<2x256xf32> to vector<2xf32>
    %2 = vector.shape_cast %1 : vector<2xf32> to vector<2x1xf32>
    %c0_1 = arith.constant 0 : index
    %c256 = arith.constant 256 : index
    %3 = vector.load %arg1[%c0_1, %c256] : memref<2x1024xf32, #tpu.memory_space<vmem>>, vector<2x256xf32>
    %cst_2 = arith.constant dense<0.000000e+00> : vector<2xf32>
    %4 = vector.multi_reduction <add>, %3, %cst_2 [1] : vector<2x256xf32> to vector<2xf32>
    %5 = vector.shape_cast %4 : vector<2xf32> to vector<2x1xf32>
    %c0_3 = arith.constant 0 : index
    %c512 = arith.constant 512 : index
    %6 = vector.load %arg1[%c0_3, %c512] : memref<2x1024xf32, #tpu.memory_space<vmem>>, vector<2x256xf32>
    %cst_4 = arith.constant dense<0.000000e+00> : vector<2xf32>
    %7 = vector.multi_reduction <add>, %6, %cst_4 [1] : vector<2x256xf32> to vector<2xf32>
    %8 = vector.shape_cast %7 : vector<2xf32> to vector<2x1xf32>
    %c0_5 = arith.constant 0 : index
    %c768 = arith.constant 768 : index
    %9 = vector.load %arg1[%c0_5, %c768] : memref<2x1024xf32, #tpu.memory_space<vmem>>, vector<2x256xf32>
    %cst_6 = arith.constant dense<0.000000e+00> : vector<2xf32>
    %10 = vector.multi_reduction <add>, %9, %cst_6 [1] : vector<2x256xf32> to vector<2xf32>
    %11 = vector.shape_cast %10 : vector<2xf32> to vector<2x1xf32>
    %12 = tpu.concatenate %2, %5, %8, %11 in 1 : vector<2x1xf32>, vector<2x1xf32>, vector<2x1xf32>, vector<2x1xf32> -> vector<2x4xf32>
    %c0_7 = arith.constant 0 : index
    %c0_8 = arith.constant 0 : index
    %13 = vector.load %arg2[%c0_7, %c0_8] : memref<4x32xf32, #tpu.memory_space<vmem>>, vector<4x32xf32>
    %cst_9 = arith.constant dense<0.000000e+00> : vector<2x32xf32>
    %14 = tpu.matmul %12, %13, %cst_9 {dimension_numbers = #tpu.dot_dimension_numbers<[1], [0], [0], [1], [0, 0, 1, 1], [], []>} : vector<2x4xf32>, vector<4x32xf32>, vector<2x32xf32> -> vector<2x32xf32>
    %c0_10 = arith.constant 0 : index
    %c0_11 = arith.constant 0 : index
    %15 = vector.load %arg3[%c0_10, %c0_11] : memref<1x32xf32, #tpu.memory_space<vmem>>, vector<1x32xf32>
    %16 = vector.broadcast %15 : vector<1x32xf32> to vector<2x32xf32>
    %17 = arith.addf %14, %16 : vector<2x32xf32>
    %cst_12 = arith.constant 0.000000e+00 : f32
    %18 = vector.broadcast %cst_12 : f32 to vector<2x32xf32>
    %19 = arith.maximumf %17, %18 : vector<2x32xf32>
    %c0_13 = arith.constant 0 : index
    %c0_14 = arith.constant 0 : index
    %20 = vector.load %arg4[%c0_13, %c0_14] : memref<32x2xf32, #tpu.memory_space<vmem>>, vector<32x2xf32>
    %cst_15 = arith.constant dense<0.000000e+00> : vector<2x2xf32>
    %21 = tpu.matmul %19, %20, %cst_15 {dimension_numbers = #tpu.dot_dimension_numbers<[1], [0], [0], [1], [0, 0, 1, 1], [], []>} : vector<2x32xf32>, vector<32x2xf32>, vector<2x2xf32> -> vector<2x2xf32>
    %c0_16 = arith.constant 0 : index
    %c0_17 = arith.constant 0 : index
    %22 = vector.load %arg5[%c0_16, %c0_17] : memref<1x2xf32, #tpu.memory_space<vmem>>, vector<1x2xf32>
    %23 = vector.broadcast %22 : vector<1x2xf32> to vector<2x2xf32>
    %24 = arith.addf %21, %23 : vector<2x2xf32>
    %c0_18 = arith.constant 0 : index
    %c0_19 = arith.constant 0 : index
    %25 = vector.load %arg6[%c0_18, %c0_19] : memref<2x2xf32, #tpu.memory_space<vmem>>, vector<2x2xf32>
    tpu.vector_store %arg6[%c0_18, %c0_19], %24 {strides = array<i32>} : memref<2x2xf32, #tpu.memory_space<vmem>>, vector<2x2xf32>,
    return
  }
  func.func @transform_0(%arg0: i32) -> (i32, i32) {
    %c0_i32 = arith.constant 0 : i32
    %c0_i32_0 = arith.constant 0 : i32
    return %arg0, %c0_i32 : i32, i32
  }
  func.func @transform_1(%arg0: i32) -> (i32, i32) {
    %c0_i32 = arith.constant 0 : i32
    %c0_i32_0 = arith.constant 0 : i32
    %c0_i32_1 = arith.constant 0 : i32
    return %c0_i32, %c0_i32_0 : i32, i32
  }
  func.func @transform_2(%arg0: i32) -> (i32, i32) {
    %c0_i32 = arith.constant 0 : i32
    %c0_i32_0 = arith.constant 0 : i32
    %c0_i32_1 = arith.constant 0 : i32
    return %c0_i32, %c0_i32_0 : i32, i32
  }
  func.func @transform_3(%arg0: i32) -> (i32, i32) {
    %c0_i32 = arith.constant 0 : i32
    %c0_i32_0 = arith.constant 0 : i32
    %c0_i32_1 = arith.constant 0 : i32
    return %c0_i32, %c0_i32_0 : i32, i32
  }
  func.func @transform_4(%arg0: i32) -> (i32, i32) {
    %c0_i32 = arith.constant 0 : i32
    %c0_i32_0 = arith.constant 0 : i32
    %c0_i32_1 = arith.constant 0 : i32
    return %c0_i32, %c0_i32_0 : i32, i32
  }
  func.func @transform_5(%arg0: i32) -> (i32, i32) {
    %c0_i32 = arith.constant 0 : i32
    %c0_i32_0 = arith.constant 0 : i32
    return %arg0, %c0_i32 : i32, i32
  }
}

</mosaic_0001>

<bundles_post_ra>
// kernel: tpu_custom_call.1
= control target key start
LH: loop header
LB: loop body
LE: loop exit
PB: predicated region body
PF: predicated region fallthrough
CT: control target
= control target key end

     0   :  { %vm33_vm0 = vcmask 1041408   ;;  %s437_s0 = inlined_call_operand.vmem [shape: f32[2,1024], index: 0, kind: input, shape index: {}]   ;;  %s438_s1 = inlined_call_operand.vmem [shape: f32[4,32], index: 1, kind: input, shape index: {}]   ;;  %s439_s2 = inlined_call_operand.vmem [shape: f32[1,32], index: 2, kind: input, shape index: {}]   ;;  %s440_s3 = inlined_call_operand.vmem [shape: f32[32,2], index: 3, kind: input, shape index: {}]   ;;  %s441_s4 = inlined_call_operand.vmem [shape: f32[1,2], index: 4, kind: input, shape index: {}]   ;;  %s442_s5 = inlined_call_operand.hbm [shape: f32[2,2], index: 5, kind: output, shape index: {}]  }
   0x1   :  { %v284_v0 = vld.sshfl [vmem:[%s437_s0] sm:$0x33 pattern:$0x76325410] }
   0x2   :  { %v30_v1 = vcombine.high %v284_v0, %v284_v0  ;;  %v34_v2 = vsel %vm33_vm0, %v284_v0, 0.0  ;;  %v286_v3 = vld.sshfl [vmem:[%s437_s0 + $0x8] sm:$0x33 pattern:$0x76325410] }
   0x3   :  { %v65_v4 = vcombine.high %v286_v3, %v286_v3  ;;  %v68_v5 = vsel %vm33_vm0, %v286_v3, 0.0  ;;  %v285_v6 = vld.sshfl [vmem:[%s437_s0 + $0x4] sm:$0x33 pattern:$0x76325410] }
   0x4   :  { %v35_v7 = vsel %vm33_vm0, %v30_v1, 0.0  ;;  %v48_v8 = vcombine.high %v285_v6, %v285_v6  ;;  %v51_v9 = vsel %vm33_vm0, %v285_v6, 0.0  ;;  %v287_v10 = vld.sshfl [vmem:[%s437_s0 + $0xc] sm:$0x33 pattern:$0x76325410] }
   0x5   :  { %v36_v11 = vadd.f32 %v35_v7, %v34_v2  ;;  %v69_v12 = vsel %vm33_vm0, %v65_v4, 0.0  ;;  %v82_v13 = vcombine.high %v287_v10, %v287_v10  ;;  %v85_v14 = vsel %vm33_vm0, %v287_v10, 0.0 }
   0x6   :  { %10 = vsyncpa [#allocation3], 0  ;;  %v70_v15 = vadd.f32 %v69_v12, %v68_v5  ;;  %v52_v16 = vsel %vm33_vm0, %v48_v8, 0.0  ;;  %v350_v20 = vmov 0.0   ;;  %v96_v21 = vld [vmem:[%s438_s1] sm:$0xf] }
   0x7   :  { %37 = vadd.xlane.f32.xlu0 %v36_v11  ;;  %v53_v17 = vadd.f32 %v52_v16, %v51_v9  ;;  %v86_v18 = vsel %vm33_vm0, %v82_v13, 0.0  ;;  %300 = vmatprep.subr.mxu0 %v350_v20  ;;  %vm108_vm1 = vcmask 1043456   ;;  %vm351_vm2 = vmmov 0   ;;  %v183_v22 = vld [vmem:[%s440_s3] sm:$0xff]  ;;  %v184_v23 = vld [vmem:[%s440_s3 + $0x8] sm:$0xff]  ;;  %v185_v33 = vld [vmem:[%s440_s3 + $0x10] sm:$0xff] }
   0x8   :  { %71 = vadd.xlane.f32.xlu1 %v70_v15  ;;  %v87_v19 = vadd.f32 %v86_v18, %v85_v14  ;;  %301 = vmatpush3.msk.msra.mxu0 %vm108_vm1, %v96_v21  ;;  %v352_v24 = vmov 0.0|0.0   ;;  %v317_v25 = vpack.c.bf16 %v184_v23, %v183_v22  ;;  %vm90_vm3 = vcmask 7168   ;;  %v186_v34 = vld [vmem:[%s440_s3 + $0x18] sm:$0xff]  ;;  %v288_v36 = vld [vmem:[%s439_s2] ss:$0 sm:$0xff]  ;;  %s353_s13 = smov [#allocation2]  }
   0x9   :  { %302 = vmatprep.mubr.msk.f32.mxu0 %vm351_vm2, %v350_v20  ;;  %313 = vmatprep.mubr.msk.f32.mxu1 %vm351_vm2, %v350_v20  ;;  %vm92_vm4 = vcmask 15360   ;;  %vm94_vm5 = vcmask 23552   ;;  %vm104_vm6 = vcmask 31744   ;;  %v320_v35 = vpack.c.bf16 %v186_v34, %v185_v33  ;;  %v291_v41 = vld [vmem:[%s441_s4] ss:$0 sm:$0xff]  ;;  %s276_s14 = sshll.u32 %s353_s13, 4  ;;  %s277_s14 = int_to_ptr.vmem [resolvable:$true] %s276_s14 }
   0xa   :  { %316 = vmatprep.subr.bf16.mxu1 %v352_v24  ;;  %vm194_vm7 = vcmask 261120   ;;  %vm268_vm8 = vcmask 9216   ;;  %s326_s3 = scalar_lea.vmem %s277_s14, 32  ;;  %p331_p1 = scmp.lt.s32.totalorder %s277_s14, %s277_s14 }
   0xb   :  { %54 = vadd.xlane.f32.xlu0 %v53_v17  ;;  %318 = vmatpush3.bf16.msra.mxu1 %v317_v25  ;;  %p327_p0 = scmp.ne.s32.totalorder %s277_s14, %s326_s3  ;;  %p332_p2 = scmp.lt.s32.totalorder %s326_s3, %s326_s3 }
   0xc   :  { %88 = vadd.xlane.f32.xlu1 %v87_v19  ;;  %319 = vmatprep.subr.bf16.mxu1 %v352_v24 }
   0xd   :  { %p333_p3 = por %p332_p2, %p331_p1 }
   0xf   :  { %321 = vmatpush3.bf16.msra.mxu1 %v320_v35  ;;  %p334_p4 = pnand %p333_p3, %p327_p0 }
  0x94   :  { %v38_v26 = vpop.xlane.xlu0 %37 }
  0x95   :  { %v72_v27 = vpop.xlane.xlu1 %71 }
  0x98   :  { %v55_v28 = vpop.xlane.xlu0 %54 }
  0x99   :  { %v91_v29 = vsel %vm90_vm3, %v38_v26, %v55_v28  ;;  %v89_v30 = vpop.xlane.xlu1 %88 }
  0x9a   :  { %v93_v31 = vsel %vm92_vm4, %v91_v29, %v72_v27 }
  0x9b   :  { %v95_v32 = vsel %vm94_vm5, %v93_v31, %v89_v30 }
  0x9c   :  { %303 = vmatmul.mubr.msk.f32.vlgmr.msra.gmra.mrb[0].mxu0 %vm104_vm6, %v95_v32 }
 0x16f   :  { %v178_v37 = vpop.f32.mrb[0].mxu0 }
 0x170   :  { %v179_v38 = vadd.f32 %v288_v36, %v178_v37  ;;  %v304_v39 = vpop.f32.mrb[1].mxu0 }
 0x172   :  { %v182_v40 = vmax.f32 %v179_v38, 0.0 }
 0x174   :  { %314 = vmatmul.mubr.msk.f32.vlgmr.msra.gmra.mrb[0].mxu1 %vm194_vm7, %v182_v40 }
 0x247   :  { %v264_v42 = vpop.f32.mrb[0].mxu1 }
 0x248   :  { %v265_v43 = vadd.f32 %v291_v41, %v264_v42  ;;  %v315_v44 = vpop.f32.mrb[1].mxu1 }
 0x24a   :  { %269 = vst.msk [vmem:[#allocation2] sm:$0x3] %vm268_vm8, %v265_v43 }
 0x24b   :  { %337 = shalt.err (!%p334_p4)
}
 0x24c   :  { %s338_s16 = scalar_lea.hbm %s442_s5, 32 }
 0x24d   :  { %p339_p5 = scmp.ne.s32.totalorder %s442_s5, %s338_s16  ;;  %p342_p6 = scmp.lt.u32.totalorder %s338_s16, %s442_s5 }
 0x24f   :  { %p344_p7 = pnand %p342_p6, %p339_p5 }
 0x251   :  { %347 = shalt.err (!%p344_p7)
}
 0x252   :  { %279 = dma.vmem_to_hbm [thread:$0]  %s277_s14, 32, %s442_s5, [#allocation3]  }
 0x253   :  { %348 = dma.done.wait [#allocation3], 32  }
 0x254   :  { %349 = vsyncadd [#allocation3], 4294967264 }
 0x255   :  { %283 = vsyncpa [#allocation3], 1 }

</bundles_post_ra>
